<compile_context>
chip_gen: v6e
topology: v6e:2x2x1
jax: 0.10.0
libtpu: 0.0.40
codegen_flags: <defaults>
</compile_context>

<pallas_src>
import jax
import jax.numpy as jnp
from jax.experimental import pallas as pl
from jax.experimental.pallas import tpu as pltpu

GAMMA = 1e-10


def _bpr_loss_kernel(p_ref, n_ref, partial_ref):
    # Elementwise loss on the (tile_m, N) row slab (VPU + EUP).
    diff = p_ref[...].astype(jnp.float32) - n_ref[...].astype(jnp.float32)
    loss = -jnp.log(GAMMA + jax.nn.sigmoid(diff))
    # Fold sublane-tile groups: (tile_m, N) -> (tile_m//8, 8, N) is a
    # tile-aligned view; sum(axis=0) is pure VPU vreg adds (no cross-lane XLU,
    # no masked scalar stores).  The single global reduce happens in the
    # wrapper epilogue.
    tm, n = loss.shape
    partial_ref[...] = loss.reshape(tm // 8, 8, n).sum(axis=0)


def _pick_tile_m(m, n, itemsize, target_block_bytes=4 << 20):
    """Largest multiple-of-8 divisor of m whose block is <= target_block_bytes."""
    max_rows = max(8, (target_block_bytes // max(1, n * itemsize)) // 8 * 8)
    if m <= max_rows:
        return m
    best = 8
    for cand in range(8, max_rows + 1, 8):
        if m % cand == 0:
            best = cand
    return best


def bpr_loss(p_score, n_score):
    assert p_score.shape == n_score.shape
    assert p_score.ndim == 2, "pass 2-D scores (flatten upstream)"
    m, n = p_score.shape
    assert m % 8 == 0 and n % 128 == 0, "pad scores to (8,128) multiples"

    tile_m = _pick_tile_m(m, n, jnp.dtype(p_score.dtype).itemsize)
    num_blocks = m // tile_m

    partials = pl.pallas_call(
        _bpr_loss_kernel,
        out_shape=jax.ShapeDtypeStruct((num_blocks * 8, n), jnp.float32),
        grid_spec=pltpu.PrefetchScalarGridSpec(
            num_scalar_prefetch=0,
            grid=(num_blocks,),
            in_specs=[
                pl.BlockSpec((tile_m, n), lambda i: (i, 0)),
                pl.BlockSpec((tile_m, n), lambda i: (i, 0)),
            ],
            out_specs=pl.BlockSpec((8, n), lambda i: (i, 0)),
        ),
        compiler_params=pltpu.CompilerParams(
            dimension_semantics=("parallel",),
            vmem_limit_bytes=32 * 1024 * 1024,
        ),
    )(p_score, n_score)

    # Tiny epilogue: reduce the (num_blocks*8, N) partial sums and take the mean.
    return jnp.sum(partials) / (m * n)


def bpr_loss_ref(p_score, n_score):
    return jnp.mean(-jnp.log(GAMMA + jax.nn.sigmoid(p_score - n_score)))


if __name__ == "__main__":
    key = jax.random.PRNGKey(0)
    kp, kn = jax.random.split(key)
    # Small, (8,128)-aligned score tensors (e.g. batch of user-item scores).
    M, N = 16, 256
    p_score = jax.random.normal(kp, (M, N), dtype=jnp.float32)
    n_score = jax.random.normal(kn, (M, N), dtype=jnp.float32)

    out = jax.block_until_ready(bpr_loss(p_score, n_score))
    ref = bpr_loss_ref(p_score, n_score)
    assert jnp.allclose(out, ref, rtol=1e-5, atol=1e-6), (out, ref)
    print("KERNEL_OK")
</pallas_src>

<mosaic_0001>
module attributes {stable_mosaic.version = 11 : i64} {
  func.func @_bpr_loss_kernel(%arg0: i32, %arg1: memref<16x256xf32, #tpu.memory_space<vmem>>, %arg2: memref<16x256xf32, #tpu.memory_space<vmem>>, %arg3: memref<8x256xf32, #tpu.memory_space<vmem>>) attributes {dimension_semantics = [#tpu.dimension_semantics<parallel>], iteration_bounds = array<i64: 1>, scalar_prefetch = 0 : i64, scratch_operands = 0 : i64, tpu.core_type = #tpu.core_type<tc>, window_params = [{transform_indices = @transform_0, window_bounds = array<i64: 16, 256>}, {transform_indices = @transform_1, window_bounds = array<i64: 16, 256>}, {transform_indices = @transform_2, window_bounds = array<i64: 8, 256>}]} {
    %c0 = arith.constant 0 : index
    %c0_0 = arith.constant 0 : index
    %0 = vector.load %arg1[%c0, %c0_0] : memref<16x256xf32, #tpu.memory_space<vmem>>, vector<16x256xf32>
    %c0_1 = arith.constant 0 : index
    %c0_2 = arith.constant 0 : index
    %1 = vector.load %arg2[%c0_1, %c0_2] : memref<16x256xf32, #tpu.memory_space<vmem>>, vector<16x256xf32>
    %2 = arith.subf %0, %1 : vector<16x256xf32>
    %3 = arith.negf %2 : vector<16x256xf32>
    %4 = math.exp %3 : vector<16x256xf32>
    %cst = arith.constant 1.000000e+00 : f32
    %5 = vector.broadcast %cst : f32 to vector<16x256xf32>
    %6 = arith.addf %5, %4 : vector<16x256xf32>
    %7 = arith.divf %5, %6 : vector<16x256xf32>
    %cst_3 = arith.constant 1.000000e-10 : f32
    %8 = vector.broadcast %cst_3 : f32 to vector<16x256xf32>
    %9 = arith.addf %8, %7 : vector<16x256xf32>
    %10 = math.log %9 : vector<16x256xf32>
    %cst_4 = arith.constant 0.000000e+00 : f32
    %11 = vector.broadcast %cst_4 : f32 to vector<16x256xf32>
    %12 = arith.subf %11, %10 : vector<16x256xf32>
    %13 = vector.shape_cast %12 : vector<16x256xf32> to vector<2x8x256xf32>
    %cst_5 = arith.constant dense<0.000000e+00> : vector<8x256xf32>
    %14 = vector.multi_reduction <add>, %13, %cst_5 [0] : vector<2x8x256xf32> to vector<8x256xf32>
    %c0_6 = arith.constant 0 : index
    %c0_7 = arith.constant 0 : index
    %15 = vector.load %arg3[%c0_6, %c0_7] : memref<8x256xf32, #tpu.memory_space<vmem>>, vector<8x256xf32>
    tpu.vector_store %arg3[%c0_6, %c0_7], %14 {strides = array<i32>} : memref<8x256xf32, #tpu.memory_space<vmem>>, vector<8x256xf32>,
    return
  }
  func.func @transform_0(%arg0: i32) -> (i32, i32) {
    %c0_i32 = arith.constant 0 : i32
    %c0_i32_0 = arith.constant 0 : i32
    return %arg0, %c0_i32 : i32, i32
  }
  func.func @transform_1(%arg0: i32) -> (i32, i32) {
    %c0_i32 = arith.constant 0 : i32
    %c0_i32_0 = arith.constant 0 : i32
    return %arg0, %c0_i32 : i32, i32
  }
  func.func @transform_2(%arg0: i32) -> (i32, i32) {
    %c0_i32 = arith.constant 0 : i32
    %c0_i32_0 = arith.constant 0 : i32
    return %arg0, %c0_i32 : i32, i32
  }
}

</mosaic_0001>

<bundles_post_ra>
// kernel: tpu_custom_call.1
= control target key start
LH: loop header
LB: loop body
LE: loop exit
PB: predicated region body
PF: predicated region fallthrough
CT: control target
= control target key end

     0   :  { %7 = vsyncpa [#allocation3], 0  ;;  %s240_s0 = inlined_call_operand.hbm [shape: f32[16,256], index: 0, kind: input, shape index: {}]   ;;  %s241_s1 = inlined_call_operand.hbm [shape: f32[16,256], index: 1, kind: input, shape index: {}]   ;;  %s242_s2 = inlined_call_operand.hbm [shape: f32[8,256], index: 2, kind: output, shape index: {}]  }
   0x1   :  { %8 = vsyncpa [#allocation6], 0 }
   0x2   :  { %9 = vsyncpa [#allocation4], 0  ;;  %s211_s9 = smov [#allocation2]  }
   0x3   :  { %s15_s10 = sshll.u32 %s211_s9, 4  ;;  %s16_s10 = int_to_ptr.vmem [resolvable:$true] %s15_s10 }
   0x4   :  { %s153_s11 = scalar_lea.vmem %s16_s10, 512  ;;  %p158_p1 = scmp.lt.s32.totalorder %s16_s10, %s16_s10 }
   0x5   :  { %p154_p0 = scmp.ne.s32.totalorder %s16_s10, %s153_s11  ;;  %p159_p2 = scmp.lt.s32.totalorder %s153_s11, %s153_s11 }
   0x7   :  { %p160_p3 = por %p159_p2, %p158_p1 }
   0x9   :  { %p161_p4 = pnand %p160_p3, %p154_p0 }
   0xb   :  { %164 = shalt.err (!%p161_p4)
}
   0xc   :  { %s212_s12 = smov 256   ;;  %s213_s13 = smov 16  }
   0xd   :  { %21 = dma.hbm_to_vmem [thread:$0]  %s240_s0, 512, %s16_s10, [#allocation3], %s212_s12, %s212_s12, %s213_s13  }
   0xe   :  { %s214_s16 = smov [#allocation5]  }
   0xf   :  { %s27_s17 = sshll.u32 %s214_s16, 4  ;;  %s28_s17 = int_to_ptr.vmem [resolvable:$true] %s27_s17 }
  0x10   :  { %s173_s18 = scalar_lea.vmem %s28_s17, 512  ;;  %p178_p6 = scmp.lt.s32.totalorder %s28_s17, %s28_s17 }
  0x11   :  { %p174_p5 = scmp.ne.s32.totalorder %s28_s17, %s173_s18  ;;  %p179_p7 = scmp.lt.s32.totalorder %s173_s18, %s173_s18 }
  0x13   :  { %p180_p8 = por %p179_p7, %p178_p6 }
  0x15   :  { %p181_p9 = pnand %p180_p8, %p174_p5 }
  0x17   :  { %184 = shalt.err (!%p181_p9)
}
  0x18   :  { %33 = dma.hbm_to_vmem [thread:$0]  %s241_s1, 512, %s28_s17, [#allocation6], %s212_s12, %s212_s12, %s213_s13  }
  0x19   :  { %205 = dma.done.wait [#allocation3], 512  }
  0x1a   :  { %206 = vsyncadd [#allocation3], 4294966784 }
  0x1b   :  { %207 = dma.done.wait [#allocation6], 512  }
  0x1c   :  { %208 = vsyncadd [#allocation6], 4294966784  ;;  %v40_v0 = vld [vmem:[#allocation2] sm:$0xff]  ;;  %v42_v1 = vld [vmem:[#allocation2 + $0x10] sm:$0xff]  ;;  %s215_s0 = smov [#allocation7]  }
  0x1d   :  { %v44_v2 = vld [vmem:[#allocation5] sm:$0xff]  ;;  %v46_v3 = vld [vmem:[#allocation5 + $0x10] sm:$0xff]  ;;  %v41_v5 = vld [vmem:[#allocation2 + $0x8] sm:$0xff]  ;;  %s102_s1 = sshll.u32 %s215_s0, 4  ;;  %s103_s1 = int_to_ptr.vmem [resolvable:$true] %s102_s1 }
  0x1e   :  { %v48_v4 = vsub.f32 %v40_v0, %v44_v2  ;;  %v43_v6 = vld [vmem:[#allocation2 + $0x18] sm:$0xff]  ;;  %v50_v7 = vsub.f32 %v42_v1, %v46_v3  ;;  %v45_v8 = vld [vmem:[#allocation5 + $0x8] sm:$0xff]  ;;  %s185_s21 = scalar_lea.vmem %s103_s1, 256  ;;  %p190_p11 = scmp.lt.s32.totalorder %s103_s1, %s103_s1 }
  0x1f   :  { %v47_v9 = vld [vmem:[#allocation5 + $0x18] sm:$0xff]  ;;  %v49_v11 = vsub.f32 %v41_v5, %v45_v8  ;;  %p186_p10 = scmp.ne.s32.totalorder %s103_s1, %s185_s21  ;;  %p191_p12 = scmp.lt.s32.totalorder %s185_s21, %s185_s21 }
  0x20   :  { %v112_v10 = vmul.f32 -1.442695, %v48_v4  ;;  %v51_v12 = vsub.f32 %v43_v6, %v47_v9  ;;  %v114_v13 = vmul.f32 -1.442695, %v50_v7 }
  0x21   :  { %v113_v14 = vmul.f32 -1.442695, %v49_v11  ;;  %p192_p13 = por %p191_p12, %p190_p11 }
  0x22   :  { %121 = vpow2.f32 %v112_v10  ;;  %v115_v15 = vmul.f32 -1.442695, %v51_v12 }
  0x23   :  { %123 = vpow2.f32 %v114_v13  ;;  %p193_p0 = pnand %p192_p13, %p186_p10 }
  0x24   :  { %125 = vpow2.f32 %v113_v14 }
  0x25   :  { %127 = vpow2.f32 %v115_v15 }
  0x2f   :  { %v122_v16 = vpop.eup %121 }
  0x30   :  { %v124_v17 = vpop.eup %123  ;;  %v64_v18 = vadd.f32 1.0, %v122_v16 }
  0x31   :  { %v126_v19 = vpop.eup %125  ;;  %v66_v20 = vadd.f32 1.0, %v124_v17 }
  0x32   :  { %v128_v21 = vpop.eup %127  ;;  %129 = vrcp.f32 %v64_v18  ;;  %v65_v22 = vadd.f32 1.0, %v126_v19 }
  0x33   :  { %131 = vrcp.f32 %v66_v20  ;;  %v67_v23 = vadd.f32 1.0, %v128_v21 }
  0x34   :  { %133 = vrcp.f32 %v65_v22 }
  0x35   :  { %135 = vrcp.f32 %v67_v23 }
  0x3f   :  { %v130_v24 = vpop.eup %129 }
  0x40   :  { %v132_v25 = vpop.eup %131  ;;  %v76_v26 = vadd.f32 1e-10, %v130_v24 }
  0x41   :  { %v134_v27 = vpop.eup %133  ;;  %v78_v28 = vadd.f32 1e-10, %v132_v25 }
  0x42   :  { %v136_v29 = vpop.eup %135  ;;  %137 = vlog2.f32 %v76_v26  ;;  %v77_v30 = vadd.f32 1e-10, %v134_v27 }
  0x43   :  { %139 = vlog2.f32 %v78_v28  ;;  %v79_v31 = vadd.f32 1e-10, %v136_v29 }
  0x44   :  { %141 = vlog2.f32 %v77_v30 }
  0x45   :  { %143 = vlog2.f32 %v79_v31 }
  0x4f   :  { %v138_v32 = vpop.eup %137 }
  0x50   :  { %v140_v33 = vpop.eup %139  ;;  %v81_v34 = vmul.f32 0.6931472, %v138_v32 }
  0x51   :  { %v142_v35 = vpop.eup %141  ;;  %v85_v36 = vmul.f32 0.6931472, %v140_v33 }
  0x52   :  { %v144_v37 = vpop.eup %143  ;;  %v88_v38 = vsub.f32 0.0, %v81_v34  ;;  %v83_v39 = vmul.f32 0.6931472, %v142_v35 }
  0x53   :  { %v90_v40 = vsub.f32 0.0, %v85_v36  ;;  %v87_v41 = vmul.f32 0.6931472, %v144_v37 }
  0x54   :  { %v89_v42 = vsub.f32 0.0, %v83_v39 }
  0x55   :  { %v92_v43 = vadd.f32 %v90_v40, %v88_v38  ;;  %v91_v44 = vsub.f32 0.0, %v87_v41 }
  0x57   :  { %94 = vst [vmem:[#allocation7] sm:$0xff] %v92_v43  ;;  %v93_v45 = vadd.f32 %v91_v44, %v89_v42 }
  0x59   :  { %95 = vst [vmem:[#allocation7 + $0x8] sm:$0xff] %v93_v45 }
  0x5a   :  { %196 = shalt.err (!%p193_p0)
}
  0x5b   :  { %105 = dma.vmem_to_hbm [thread:$0]  %s103_s1, 256, %s242_s2, [#allocation4]  }
  0x5c   :  { %209 = dma.done.wait [#allocation4], 256  }
  0x5d   :  { %210 = vsyncadd [#allocation4], 4294967040 }
  0x5e   :  { %109 = vsyncpa [#allocation3], 1 }
  0x5f   :  { %110 = vsyncpa [#allocation6], 1 }
  0x60   :  { %111 = vsyncpa [#allocation4], 1 }

</bundles_post_ra>
